<compile_context>
chip_gen: v7x
topology: tpu7x:2x2x1
jax: 0.10.0
libtpu: 0.0.40
codegen_flags: <defaults>
</compile_context>

<pallas_src>
import functools

import jax
import jax.numpy as jnp
from jax.experimental import pallas as pl
from jax.experimental.pallas import tpu as pltpu

_HIDDEN = 64
_MIN_SPLIT_ROWS = 512   # never shrink tiles below this just to split for megacore


def _round_up(n, m):
    return ((n + m - 1) // m) * m


# ---------------------------------------------------------------------------
# One-time, cached capability probes.  These replace the old per-call
# try/except rebuild: the real kernel build below is never wrapped in an
# exception handler, so genuine lowering errors surface directly.
# ---------------------------------------------------------------------------
@functools.lru_cache(maxsize=None)
def _supports_pipeline_mode():
    """Does this jax build accept BlockSpec(pipeline_mode=pl.Buffered(k))?"""
    if not hasattr(pl, "Buffered"):
        return False
    try:
        pl.BlockSpec((8, 128), lambda i: (0, 0), pipeline_mode=pl.Buffered(3))
        return True
    except TypeError:
        return False


@functools.lru_cache(maxsize=None)
def _lane_dense_ok(action_size):
    """Can Mosaic lower the (8k, A) -> (k, 8*A) value reshape used for the
    lane-dense output store?  Probed once by AOT-compiling a micro kernel.
    On failure we fall back to the plain (A-lane, masked-store) output path,
    so a missing feature never breaks the real kernel."""
    if (8 * action_size) % 128 != 0:
        return False

    rows = 104  # 13 packed rows: also covers a dest sublane count not % 8

    def probe_kernel(x_ref, o_ref):
        v = x_ref[...] + 1.0                      # force a real vector value
        o_ref[...] = v.reshape(rows // 8, 8 * action_size)

    probe = pl.pallas_call(
        probe_kernel,
        out_shape=jax.ShapeDtypeStruct((rows // 8, 8 * action_size),
                                       jnp.float32))
    try:
        jax.jit(probe).lower(
            jax.ShapeDtypeStruct((rows, action_size), jnp.float32)).compile()
        return True
    except Exception:  # deliberate, narrow capability probe (see docstring)
        return False


# ---------------------------------------------------------------------------
# Kernel
# ---------------------------------------------------------------------------
def _actor_mlp_kernel(x_ref, w1_ref, b1_ref, w2_ref, b2_ref, w3_ref, b3_ref,
                      o_ref, *, mxu_dtype, lane_dense):
    """Fused Linear->ReLU->Linear->ReLU->Linear on one batch tile.

    Matmuls run on the MXU with `mxu_dtype` operands and f32 accumulation.
    Weights/biases arrive pre-cast from the wrapper (grid-invariant, resident
    in VMEM), so the only per-step casts are on the streaming activations.
    Bias add / ReLU stay in f32 on the VPU (v5e has no bf16 VALU).
    """
    x = x_ref[...].astype(mxu_dtype)

    h1 = jnp.dot(x, w1_ref[...], preferred_element_type=jnp.float32)
    h1 = jnp.maximum(h1 + b1_ref[...], 0.0)

    h2 = jnp.dot(h1.astype(mxu_dtype), w2_ref[...],
                 preferred_element_type=jnp.float32)
    h2 = jnp.maximum(h2 + b2_ref[...], 0.0)

    out = jnp.dot(h2.astype(mxu_dtype), w3_ref[...],
                  preferred_element_type=jnp.float32) + b3_ref[...]

    if lane_dense:
        # Pack 8 batch rows into one 128-lane row so the store is a full-width
        # vst and the writeback DMA is dense (A=16 alone masks 16/128 lanes).
        # The wrapper reshapes back (row-major, free).
        tile, a = out.shape
        out = out.reshape(tile // 8, 8 * a)

    o_ref[...] = out.astype(o_ref.dtype)


# ---------------------------------------------------------------------------
# Cached pallas_call builder (one per static configuration)
# ---------------------------------------------------------------------------
@functools.lru_cache(maxsize=None)
def _build_actor_call(x_rows, feat, hidden, act, tile, lane_dense,
                      mxu_dtype_name, x_buffers):
    mxu_dtype = jnp.dtype(mxu_dtype_name)
    grid = (pl.cdiv(x_rows, tile),)
    rows8 = _round_up(x_rows, 8)

    # x is the only streaming input; optionally deepen its pipeline if
    # profiling shows exposed DMA (weights stay at the default — their
    # index_map is constant, so Pallas never re-fetches them anyway).
    x_mode = {}
    if x_buffers != 2 and _supports_pipeline_mode():
        x_mode = {"pipeline_mode": pl.Buffered(x_buffers)}

    if lane_dense:
        out_shape = jax.ShapeDtypeStruct((rows8 // 8, 8 * act), jnp.float32)
        out_spec = pl.BlockSpec((tile // 8, 8 * act), lambda i: (i, 0))
    else:
        out_shape = jax.ShapeDtypeStruct((x_rows, act), jnp.float32)
        out_spec = pl.BlockSpec((tile, act), lambda i: (i, 0))

    w_bytes = (feat * hidden + hidden * hidden + hidden * act) * mxu_dtype.itemsize
    cost = pl.CostEstimate(
        flops=2 * x_rows * (feat * hidden + hidden * hidden + hidden * act),
        transcendentals=0,
        bytes_accessed=4 * x_rows * (feat + act) + w_bytes + 4 * (2 * hidden + act))

    kernel = functools.partial(_actor_mlp_kernel, mxu_dtype=mxu_dtype,
                               lane_dense=lane_dense)

    return pl.pallas_call(
        kernel,
        out_shape=out_shape,
        grid_spec=pltpu.PrefetchScalarGridSpec(
            num_scalar_prefetch=0,
            grid=grid,
            in_specs=[
                pl.BlockSpec((tile, feat), lambda i: (i, 0), **x_mode),  # x streams
                pl.BlockSpec((feat, hidden), lambda i: (0, 0)),          # w1 resident
                pl.BlockSpec((1, hidden), lambda i: (0, 0)),             # b1
                pl.BlockSpec((hidden, hidden), lambda i: (0, 0)),        # w2
                pl.BlockSpec((1, hidden), lambda i: (0, 0)),             # b2
                pl.BlockSpec((hidden, act), lambda i: (0, 0)),           # w3
                pl.BlockSpec((1, act), lambda i: (0, 0)),                # b3
            ],
            out_specs=out_spec,
        ),
        compiler_params=pltpu.CompilerParams(
            # Batch tiles are independent -> shard across TCs (v7x megacore).
            dimension_semantics=("parallel",)),
        cost_estimate=cost,
    )


# ---------------------------------------------------------------------------
# Wrapper
# ---------------------------------------------------------------------------
def actor_net_forward(x, params, *, batch_tile=512, mxu_dtype=jnp.bfloat16,
                      x_buffers=2):
    """x: (B, state_feature_size) f32 -> (B, action_size) f32.

    batch_tile: rows per grid step for large batches (sweep 512..2048).
    mxu_dtype : matmul operand dtype (bf16 on all generations; f32 for exact).
    x_buffers : pipeline depth for the streaming x input (2 = default).
    """
    w1, b1, w2, b2, w3, b3 = params
    B, F = x.shape
    H = w1.shape[1]
    A = w3.shape[1]
    mxu_dtype = jnp.dtype(mxu_dtype)

    # ---- batch tiling: the only axis that can fill the MXU -----------------
    rows8 = _round_up(B, 8)
    tile = min(_round_up(batch_tile, 64), rows8)
    # v7x megacore: if one tile would swallow a batch big enough for two
    # >=512-row tiles, split in two so ("parallel",) feeds both TensorCores.
    if tile == rows8 and rows8 >= 2 * _MIN_SPLIT_ROWS:
        tile = _round_up(pl.cdiv(rows8, 2), 64)
    if tile < rows8:
        tile = _round_up(tile, 64)  # multi-step grid: keep out blocks (8,128)-aligned

    grid_steps = pl.cdiv(B, tile)
    if grid_steps == 1 and rows8 != B:
        # Single-step path only: pad by at most 7 rows (negligible copy).
        x_in = jnp.pad(x, ((0, rows8 - B), (0, 0)))
        x_rows = rows8
    else:
        # Multi-step path: no pad; Pallas handles the ragged last block
        # (garbage rows stay in garbage output rows, which we never read).
        x_in = x
        x_rows = B

    lane_dense = _lane_dense_ok(A)

    # Pre-cast grid-invariant weights ONCE (avoids a per-step cast in VMEM).
    if w1.dtype != mxu_dtype:
        w1, w2, w3 = (w.astype(mxu_dtype) for w in (w1, w2, w3))
    b1, b2, b3 = (b.astype(jnp.float32).reshape(1, -1) for b in (b1, b2, b3))

    call = _build_actor_call(x_rows, F, H, A, tile, lane_dense,
                             mxu_dtype.name, x_buffers)
    out = call(x_in, w1, b1, w2, b2, w3, b3)

    if lane_dense:
        out = out.reshape(_round_up(x_rows, 8), A)
    return out[:B] if out.shape[0] != B else out


# ---------------------------------------------------------------------------
# Params + references
# ---------------------------------------------------------------------------
def init_actor_params(key, state_feature_size, action_size, hidden_size=_HIDDEN):
    """Deterministic synthetic init (uniform, PyTorch-like scale)."""
    ks = jax.random.split(key, 6)

    def lin_init(kw, kb, fan_in, fan_out):
        bound = 1.0 / float(fan_in) ** 0.5
        w = jax.random.uniform(kw, (fan_in, fan_out), jnp.float32, -bound, bound)
        b = jax.random.uniform(kb, (1, fan_out), jnp.float32, -bound, bound)
        return w, b

    w1, b1 = lin_init(ks[0], ks[1], state_feature_size, hidden_size)
    w2, b2 = lin_init(ks[2], ks[3], hidden_size, hidden_size)
    w3, b3 = lin_init(ks[4], ks[5], hidden_size, action_size)
    return (w1, b1, w2, b2, w3, b3)


def actor_net_reference(x, params, mxu_dtype=jnp.float32):
    """Pure-JAX reference mirroring the kernel's operand dtype exactly."""
    w1, b1, w2, b2, w3, b3 = params
    d = jnp.dtype(mxu_dtype)

    def dot(a, b):
        return jnp.dot(a.astype(d), b.astype(d),
                       preferred_element_type=jnp.float32)

    h1 = jnp.maximum(dot(x, w1) + b1.reshape(1, -1), 0.0)
    h2 = jnp.maximum(dot(h1, w2) + b2.reshape(1, -1), 0.0)
    return dot(h2, w3) + b3.reshape(1, -1)


# ---------------------------------------------------------------------------
# Self-test
# ---------------------------------------------------------------------------
if __name__ == "__main__":
    key = jax.random.PRNGKey(0)
    k_p, k1, k2, k3 = jax.random.split(key, 4)

    F, A = 32, 16
    params = init_actor_params(k_p, F, A)

    # 1) Small ragged batch, exact f32 MXU path (tight check).
    x1 = jax.random.normal(k1, (6, F), dtype=jnp.float32)
    out_f32 = jax.block_until_ready(
        actor_net_forward(x1, params, mxu_dtype=jnp.float32))
    ref_f32 = actor_net_reference(x1, params, jnp.float32)
    assert out_f32.shape == (6, A)
    assert jnp.allclose(out_f32, ref_f32, atol=2e-5, rtol=2e-5), \
        "f32 path mismatch vs reference"

    # 2) Same batch, default bf16-MXU path vs a bf16-operand reference.
    out_bf = jax.block_until_ready(actor_net_forward(x1, params))
    ref_bf = actor_net_reference(x1, params, jnp.bfloat16)
    assert jnp.allclose(out_bf, ref_bf, atol=5e-3, rtol=5e-3), \
        "bf16 path mismatch vs bf16 reference"
    assert jnp.allclose(out_bf, ref_f32, atol=1e-1, rtol=1e-1), \
        "bf16 path grossly off vs f32 reference"

    # 3) Multi-step ragged grid (300 rows, 128-row tiles -> 3 steps, ragged tail).
    x2 = jax.random.normal(k2, (300, F), dtype=jnp.float32)
    out2 = jax.block_until_ready(actor_net_forward(x2, params, batch_tile=128))
    ref2 = actor_net_reference(x2, params, jnp.bfloat16)
    assert out2.shape == (300, A)
    assert jnp.allclose(out2, ref2, atol=5e-3, rtol=5e-3), \
        "ragged multi-tile mismatch vs bf16 reference"

    # 4) Batch large enough to trigger the v7x two-step split (tile capped).
    x3 = jax.random.normal(k3, (1200, F), dtype=jnp.float32)
    out3 = jax.block_until_ready(actor_net_forward(x3, params, batch_tile=2048))
    ref3 = actor_net_reference(x3, params, jnp.bfloat16)
    assert out3.shape == (1200, A)
    assert jnp.allclose(out3, ref3, atol=5e-3, rtol=5e-3), \
        "megacore-split path mismatch vs bf16 reference"

    print("KERNEL_OK")
</pallas_src>

<mosaic_0001>
module attributes {stable_mosaic.version = 11 : i64} {
  func.func @_actor_mlp_kernel(%arg0: i32, %arg1: memref<8x32xf32, #tpu.memory_space<vmem>>, %arg2: memref<32x64xf32, #tpu.memory_space<vmem>>, %arg3: memref<1x64xf32, #tpu.memory_space<vmem>>, %arg4: memref<64x64xf32, #tpu.memory_space<vmem>>, %arg5: memref<1x64xf32, #tpu.memory_space<vmem>>, %arg6: memref<64x16xf32, #tpu.memory_space<vmem>>, %arg7: memref<1x16xf32, #tpu.memory_space<vmem>>, %arg8: memref<8x16xf32, #tpu.memory_space<vmem>>) attributes {dimension_semantics = [#tpu.dimension_semantics<parallel>], iteration_bounds = array<i64: 1>, scalar_prefetch = 0 : i64, scratch_operands = 0 : i64, tpu.core_type = #tpu.core_type<tc>, window_params = [{transform_indices = @transform_0, window_bounds = array<i64: 8, 32>}, {pipeline_mode = #tpu.pipeline_mode<synchronous>, transform_indices = @transform_1, window_bounds = array<i64: 32, 64>}, {pipeline_mode = #tpu.pipeline_mode<synchronous>, transform_indices = @transform_2, window_bounds = array<i64: 1, 64>}, {pipeline_mode = #tpu.pipeline_mode<synchronous>, transform_indices = @transform_3, window_bounds = array<i64: 64, 64>}, {pipeline_mode = #tpu.pipeline_mode<synchronous>, transform_indices = @transform_4, window_bounds = array<i64: 1, 64>}, {pipeline_mode = #tpu.pipeline_mode<synchronous>, transform_indices = @transform_5, window_bounds = array<i64: 64, 16>}, {pipeline_mode = #tpu.pipeline_mode<synchronous>, transform_indices = @transform_6, window_bounds = array<i64: 1, 16>}, {transform_indices = @transform_7, window_bounds = array<i64: 8, 16>}]} {
    %c0 = arith.constant 0 : index
    %c0_0 = arith.constant 0 : index
    %0 = vector.load %arg1[%c0, %c0_0] : memref<8x32xf32, #tpu.memory_space<vmem>>, vector<8x32xf32>
    %c0_1 = arith.constant 0 : index
    %c0_2 = arith.constant 0 : index
    %1 = vector.load %arg2[%c0_1, %c0_2] : memref<32x64xf32, #tpu.memory_space<vmem>>, vector<32x64xf32>
    %cst = arith.constant dense<0.000000e+00> : vector<8x64xf32>
    %2 = tpu.matmul %0, %1, %cst {dimension_numbers = #tpu.dot_dimension_numbers<[1], [0], [0], [1], [0, 0, 1, 1], [], []>} : vector<8x32xf32>, vector<32x64xf32>, vector<8x64xf32> -> vector<8x64xf32>
    %c0_3 = arith.constant 0 : index
    %c0_4 = arith.constant 0 : index
    %3 = vector.load %arg3[%c0_3, %c0_4] : memref<1x64xf32, #tpu.memory_space<vmem>>, vector<1x64xf32>
    %4 = vector.broadcast %3 : vector<1x64xf32> to vector<8x64xf32>
    %5 = arith.addf %2, %4 : vector<8x64xf32>
    %cst_5 = arith.constant 0.000000e+00 : f32
    %6 = vector.broadcast %cst_5 : f32 to vector<8x64xf32>
    %7 = arith.maximumf %5, %6 : vector<8x64xf32>
    %c0_6 = arith.constant 0 : index
    %c0_7 = arith.constant 0 : index
    %8 = vector.load %arg4[%c0_6, %c0_7] : memref<64x64xf32, #tpu.memory_space<vmem>>, vector<64x64xf32>
    %cst_8 = arith.constant dense<0.000000e+00> : vector<8x64xf32>
    %9 = tpu.matmul %7, %8, %cst_8 {dimension_numbers = #tpu.dot_dimension_numbers<[1], [0], [0], [1], [0, 0, 1, 1], [], []>} : vector<8x64xf32>, vector<64x64xf32>, vector<8x64xf32> -> vector<8x64xf32>
    %c0_9 = arith.constant 0 : index
    %c0_10 = arith.constant 0 : index
    %10 = vector.load %arg5[%c0_9, %c0_10] : memref<1x64xf32, #tpu.memory_space<vmem>>, vector<1x64xf32>
    %11 = vector.broadcast %10 : vector<1x64xf32> to vector<8x64xf32>
    %12 = arith.addf %9, %11 : vector<8x64xf32>
    %cst_11 = arith.constant 0.000000e+00 : f32
    %13 = vector.broadcast %cst_11 : f32 to vector<8x64xf32>
    %14 = arith.maximumf %12, %13 : vector<8x64xf32>
    %c0_12 = arith.constant 0 : index
    %c0_13 = arith.constant 0 : index
    %15 = vector.load %arg6[%c0_12, %c0_13] : memref<64x16xf32, #tpu.memory_space<vmem>>, vector<64x16xf32>
    %cst_14 = arith.constant dense<0.000000e+00> : vector<8x16xf32>
    %16 = tpu.matmul %14, %15, %cst_14 {dimension_numbers = #tpu.dot_dimension_numbers<[1], [0], [0], [1], [0, 0, 1, 1], [], []>} : vector<8x64xf32>, vector<64x16xf32>, vector<8x16xf32> -> vector<8x16xf32>
    %c0_15 = arith.constant 0 : index
    %c0_16 = arith.constant 0 : index
    %17 = vector.load %arg7[%c0_15, %c0_16] : memref<1x16xf32, #tpu.memory_space<vmem>>, vector<1x16xf32>
    %18 = vector.broadcast %17 : vector<1x16xf32> to vector<8x16xf32>
    %19 = arith.addf %16, %18 : vector<8x16xf32>
    %c0_17 = arith.constant 0 : index
    %c0_18 = arith.constant 0 : index
    %20 = vector.load %arg8[%c0_17, %c0_18] : memref<8x16xf32, #tpu.memory_space<vmem>>, vector<8x16xf32>
    tpu.vector_store %arg8[%c0_17, %c0_18], %19 {strides = array<i32>} : memref<8x16xf32, #tpu.memory_space<vmem>>, vector<8x16xf32>,
    return
  }
  func.func @transform_0(%arg0: i32) -> (i32, i32) {
    %c0_i32 = arith.constant 0 : i32
    %c0_i32_0 = arith.constant 0 : i32
    return %arg0, %c0_i32 : i32, i32
  }
  func.func @transform_1(%arg0: i32) -> (i32, i32) {
    %c0_i32 = arith.constant 0 : i32
    %c0_i32_0 = arith.constant 0 : i32
    %c0_i32_1 = arith.constant 0 : i32
    return %c0_i32, %c0_i32_0 : i32, i32
  }
  func.func @transform_2(%arg0: i32) -> (i32, i32) {
    %c0_i32 = arith.constant 0 : i32
    %c0_i32_0 = arith.constant 0 : i32
    %c0_i32_1 = arith.constant 0 : i32
    return %c0_i32, %c0_i32_0 : i32, i32
  }
  func.func @transform_3(%arg0: i32) -> (i32, i32) {
    %c0_i32 = arith.constant 0 : i32
    %c0_i32_0 = arith.constant 0 : i32
    %c0_i32_1 = arith.constant 0 : i32
    return %c0_i32, %c0_i32_0 : i32, i32
  }
  func.func @transform_4(%arg0: i32) -> (i32, i32) {
    %c0_i32 = arith.constant 0 : i32
    %c0_i32_0 = arith.constant 0 : i32
    %c0_i32_1 = arith.constant 0 : i32
    return %c0_i32, %c0_i32_0 : i32, i32
  }
  func.func @transform_5(%arg0: i32) -> (i32, i32) {
    %c0_i32 = arith.constant 0 : i32
    %c0_i32_0 = arith.constant 0 : i32
    %c0_i32_1 = arith.constant 0 : i32
    return %c0_i32, %c0_i32_0 : i32, i32
  }
  func.func @transform_6(%arg0: i32) -> (i32, i32) {
    %c0_i32 = arith.constant 0 : i32
    %c0_i32_0 = arith.constant 0 : i32
    %c0_i32_1 = arith.constant 0 : i32
    return %c0_i32, %c0_i32_0 : i32, i32
  }
  func.func @transform_7(%arg0: i32) -> (i32, i32) {
    %c0_i32 = arith.constant 0 : i32
    %c0_i32_0 = arith.constant 0 : i32
    return %arg0, %c0_i32 : i32, i32
  }
}

</mosaic_0001>

<bundles_post_ra>
// kernel: tpu_custom_call.1
= control target key start
LH: loop header
LB: loop body
LE: loop exit
PB: predicated region body
PF: predicated region fallthrough
CT: control target
= control target key end

     0   :  { %12 = vsyncpa [#allocation3], 0  ;;  %s620_s0 = inlined_call_operand.vmem [shape: f32[8,32], index: 0, kind: input, shape index: {}]   ;;  %s621_s1 = inlined_call_operand.hbm [shape: f32[32,64], index: 1, kind: input, shape index: {}]   ;;  %s622_s2 = inlined_call_operand.vmem [shape: f32[1,64], index: 2, kind: input, shape index: {}]   ;;  %s623_s3 = inlined_call_operand.vmem [shape: f32[64,64], index: 3, kind: input, shape index: {}]   ;;  %s624_s4 = inlined_call_operand.vmem [shape: f32[1,64], index: 4, kind: input, shape index: {}]   ;;  %s625_s5 = inlined_call_operand.vmem [shape: f32[64,16], index: 5, kind: input, shape index: {}]   ;;  %s626_s6 = inlined_call_operand.vmem [shape: f32[1,16], index: 6, kind: input, shape index: {}]   ;;  %s627_s7 = inlined_call_operand.hbm [shape: f32[8,16], index: 7, kind: output, shape index: {}]  }
   0x1   :  { %13 = vsyncpa [#allocation4], 0  ;;  %s486_s24 = smov [#allocation2]   ;;  %s438_s28 = scalar_lea.hbm %s621_s1, 512 }
   0x2   :  { %s21_s25 = sshll.u32 %s486_s24, 4  ;;  %p439_p0 = scmp.ne.s32.totalorder %s621_s1, %s438_s28  ;;  %s22_s25 = int_to_ptr.vmem [resolvable:$true] %s21_s25 }
   0x3   :  { %p442_p1 = scmp.lt.u32.totalorder %s438_s28, %s621_s1 }
   0x5   :  { %p444_p2 = pnand %p442_p1, %p439_p0 }
   0x7   :  { %447 = shalt.err (!%p444_p2)
}
   0x8   :  { %s448_s10 = scalar_lea.vmem %s22_s25, 512  ;;  %p453_p4 = scmp.lt.s32.totalorder %s22_s25, %s22_s25 }
   0x9   :  { %p449_p3 = scmp.ne.s32.totalorder %s22_s25, %s448_s10  ;;  %p454_p5 = scmp.lt.s32.totalorder %s448_s10, %s448_s10 }
   0xb   :  { %p455_p6 = por %p454_p5, %p453_p4 }
   0xd   :  { %p456_p7 = pnand %p455_p6, %p449_p3 }
   0xf   :  { %459 = shalt.err (!%p456_p7)
}
  0x10   :  { %s487_s11 = smov 128   ;;  %s488_s12 = smov 8  }
  0x11   :  { %27 = dma.hbm_to_vmem [thread:$0]  %s621_s1, 512, %s22_s25, [#allocation3], %s487_s11, %s487_s11, %s488_s12  }
  0x12   :  { %482 = dma.done.wait [#allocation3], 512  }
  0x13   :  { %483 = vsyncadd [#allocation3], 4294966784  ;;  %v489_v0 = vmov 0.0|0.0   ;;  %vm490_vm0 = vmmov 0   ;;  %v491_v1 = vmov 0.0   ;;  %v42_v2 = vld [vmem:[#allocation2] sm:$0xff] }
  0x14   :  { %401 = vmatprep.subr.bf16.mxu0 %v489_v0  ;;  %360 = vmatprep.mubr.msk.f32.mxu0 %vm490_vm0, %v491_v1  ;;  %v43_v3 = vld [vmem:[#allocation2 + $0x8] sm:$0xff]  ;;  %v44_v4 = vld [vmem:[#allocation2 + $0x10] sm:$0xff]  ;;  %v45_v6 = vld [vmem:[#allocation2 + $0x18] sm:$0xff]  ;;  %vm53_vm1 = vcmask 261120   ;;  %vm143_vm2 = vcmask 523264   ;;  %s492_s27 = smov [#allocation5]  }
  0x15   :  { %407 = vmatprep.subr.bf16.mxu1 %v489_v0  ;;  %379 = vmatprep.mubr.msk.f32.mxu1 %vm490_vm0, %v491_v1  ;;  %v402_v5 = vpack.c.bf16 %v43_v3, %v42_v2  ;;  %v128_v7 = vld [vmem:[%s623_s3] sm:$0xff]  ;;  %v129_v8 = vld [vmem:[%s623_s3 + $0x8] sm:$0xff]  ;;  %v130_v9 = vld [vmem:[%s623_s3 + $0x10] sm:$0xff]  ;;  %v405_v11 = vpack.c.bf16 %v45_v6, %v44_v4  ;;  %s314_s28 = sshll.u32 %s492_s27, 4  ;;  %vm306_vm3 = vcmask 130048   ;;  %s315_s28 = int_to_ptr.vmem [resolvable:$true] %s314_s28 }
  0x16   :  { %v131_v10 = vld [vmem:[%s623_s3 + $0x18] sm:$0xff]  ;;  %v408_v12 = vpack.c.bf16 %v129_v8, %v128_v7  ;;  %v132_v14 = vld [vmem:[%s623_s3 + $0x20] sm:$0xff]  ;;  %v133_v15 = vld [vmem:[%s623_s3 + $0x28] sm:$0xff]  ;;  %p465_p9 = scmp.lt.s32.totalorder %s315_s28, %s315_s28 }
  0x17   :  { %403 = vmatpush3.bf16.msra.mxu0 %v402_v5  ;;  %v411_v13 = vpack.c.bf16 %v131_v10, %v130_v9  ;;  %v41_v16 = vld [vmem:[%s620_s0] sm:$0xff]  ;;  %v414_v17 = vpack.c.bf16 %v133_v15, %v132_v14  ;;  %v134_v18 = vld [vmem:[%s623_s3 + $0x30] sm:$0xff]  ;;  %v135_v19 = vld [vmem:[%s623_s3 + $0x38] sm:$0xff] }
  0x18   :  { %404 = vmatprep.subr.bf16.mxu0 %v489_v0  ;;  %409 = vmatpush3.bf16.msra.mxu1 %v408_v12  ;;  %v417_v20 = vpack.c.bf16 %v135_v19, %v134_v18  ;;  %v218_v21 = vld [vmem:[%s625_s5] sm:$0xff]  ;;  %v219_v22 = vld [vmem:[%s625_s5 + $0x8] sm:$0xff]  ;;  %v220_v23 = vld [vmem:[%s625_s5 + $0x10] sm:$0xff] }
  0x19   :  { %410 = vmatprep.subr.bf16.mxu1 %v489_v0  ;;  %v420_v24 = vpack.c.bf16 %v219_v22, %v218_v21  ;;  %v221_v25 = vld [vmem:[%s625_s5 + $0x18] sm:$0xff]  ;;  %v222_v27 = vld [vmem:[%s625_s5 + $0x20] sm:$0xff]  ;;  %v223_v28 = vld [vmem:[%s625_s5 + $0x28] sm:$0xff] }
  0x1a   :  { %v423_v26 = vpack.c.bf16 %v221_v25, %v220_v23  ;;  %v426_v29 = vpack.c.bf16 %v223_v28, %v222_v27  ;;  %v323_v30 = vld [vmem:[%s622_s2] ss:$0 sm:$0xff]  ;;  %v224_v35 = vld [vmem:[%s625_s5 + $0x30] sm:$0xff]  ;;  %v225_v36 = vld [vmem:[%s625_s5 + $0x38] sm:$0xff]  ;;  %s460_s5 = scalar_lea.vmem %s315_s28, 128 }
  0x1b   :  { %406 = vmatpush3.bf16.msra.mxu0 %v405_v11  ;;  %v429_v37 = vpack.c.bf16 %v225_v36, %v224_v35  ;;  %v325_v38 = vld [vmem:[%s624_s4] ss:$0 sm:$0xff]  ;;  %p461_p8 = scmp.ne.s32.totalorder %s315_s28, %s460_s5  ;;  %p466_p10 = scmp.lt.s32.totalorder %s460_s5, %s460_s5 }
  0x1c   :  { %419 = vmatprep.subr.bf16.mxu0 %v489_v0  ;;  %412 = vmatpush3.bf16.msra.mxu1 %v411_v13  ;;  %v327_v43 = vld [vmem:[%s626_s6] ss:$0 sm:$0xff] }
  0x1d   :  { %413 = vmatprep.subr.bf16.mxu1 %v489_v0  ;;  %p467_p11 = por %p466_p10, %p465_p9 }
  0x1e   :  { %361 = vmatmul.mubr.msk.f32.vlgmr.msra.gmra.mrb[0].mxu0 %vm53_vm1, %v41_v16 }
  0x1f   :  { %398 = vmatprep.mubr.msk.f32.mxu0 %vm490_vm0, %v491_v1  ;;  %421 = vmatpush3.bf16.msra.mxu0 %v420_v24  ;;  %p468_p12 = pnand %p467_p11, %p461_p8 }
  0x20   :  { %415 = vmatpush3.bf16.msra.mxu1 %v414_v17  ;;  %422 = vmatprep.subr.bf16.mxu0 %v489_v0 }
  0x21   :  { %416 = vmatprep.subr.bf16.mxu1 %v489_v0 }
  0x23   :  { %424 = vmatpush3.bf16.msra.mxu0 %v423_v26 }
  0x24   :  { %418 = vmatpush3.bf16.msra.mxu1 %v417_v20  ;;  %425 = vmatprep.subr.bf16.mxu0 %v489_v0 }
  0x27   :  { %427 = vmatpush3.bf16.msra.mxu0 %v426_v29 }
  0x28   :  { %428 = vmatprep.subr.bf16.mxu0 %v489_v0 }
  0x2b   :  { %430 = vmatpush3.bf16.msra.mxu0 %v429_v37 }
  0xf1   :  { %v123_v31 = vpop.f32.mrb[0].mxu0 }
  0xf2   :  { %v124_v32 = vadd.f32 %v323_v30, %v123_v31  ;;  %v362_v33 = vpop.f32.mrb[1].mxu0 }
  0xf4   :  { %v127_v34 = vmax.f32 %v124_v32, 0.0 }
  0xf6   :  { %380 = vmatmul.mubr.msk.f32.vlgmr.msra.gmra.mrb[0].mxu1 %vm143_vm2, %v127_v34 }
 0x1c9   :  { %v213_v39 = vpop.f32.mrb[0].mxu1 }
 0x1ca   :  { %v214_v40 = vadd.f32 %v325_v38, %v213_v39  ;;  %v381_v41 = vpop.f32.mrb[1].mxu1 }
 0x1cc   :  { %v217_v42 = vmax.f32 %v214_v40, 0.0 }
 0x1ce   :  { %399 = vmatmul.mubr.msk.f32.vlgmr.msra.gmra.mrb[2].mxu0 %vm143_vm2, %v217_v42 }
 0x2a1   :  { %v302_v44 = vpop.f32.mrb[2].mxu0 }
 0x2a2   :  { %v303_v45 = vadd.f32 %v327_v43, %v302_v44  ;;  %v400_v46 = vpop.f32.mrb[3].mxu0 }
 0x2a4   :  { %307 = vst.msk [vmem:[#allocation5] sm:$0xff] %vm306_vm3, %v303_v45 }
 0x2a5   :  { %471 = shalt.err (!%p468_p12)
}
 0x2a6   :  { %s472_s30 = scalar_lea.hbm %s627_s7, 128 }
 0x2a7   :  { %p473_p13 = scmp.ne.s32.totalorder %s627_s7, %s472_s30  ;;  %p476_p0 = scmp.lt.u32.totalorder %s472_s30, %s627_s7 }
 0x2a9   :  { %p478_p1 = pnand %p476_p0, %p473_p13 }
 0x2ab   :  { %481 = shalt.err (!%p478_p1)
}
 0x2ac   :  { %317 = dma.vmem_to_hbm [thread:$0]  %s315_s28, 128, %s627_s7, [#allocation4]  }
 0x2ad   :  { %484 = dma.done.wait [#allocation4], 128  }
 0x2ae   :  { %485 = vsyncadd [#allocation4], 4294967168 }
 0x2af   :  { %321 = vsyncpa [#allocation3], 1 }
 0x2b0   :  { %322 = vsyncpa [#allocation4], 1 }

</bundles_post_ra>
